<compile_context>
chip_gen: v6e
topology: v6e:2x2x1
jax: 0.10.0
libtpu: 0.0.40
codegen_flags: <defaults>
</compile_context>

<pallas_src>
import functools

import jax
import jax.numpy as jnp
from jax.experimental import pallas as pl
from jax.experimental.pallas import tpu as pltpu

LANES = 128          # TPU lane width: padded feature / class width everywhere
BIAS_ROWS = 8        # f32 sublane tile height for the bias slab
NEG_BIG = -1e30      # bias for padded class lanes -> exp() underflows to 0.0


# ----------------------------- Pallas kernel ------------------------------ #
def gcn5_kernel(a_ref, x_ref, w_ref, b_ref, out_ref, *, n_layers):
    """Fused 5-layer GCN forward + log_softmax (all operands lane-dense).

    a_ref  : [N, N]        bf16  normalized adjacency Â = D^{-1/2}(A+I)D^{-1/2}
    x_ref  : [N, 128]      bf16  node features, zero-padded to 128 lanes
    w_ref  : [L, 128, 128] bf16  per-layer zero-padded weight blocks
    b_ref  : [8, 128]      f32   per-layer bias rows (last layer pad = -1e30)
    out_ref: [N, 128]      f32   lane-dense log-softmax (first C lanes valid)
    """
    a = a_ref[...]                       # bf16 [N, N]    (loaded once)
    h = x_ref[...]                       # bf16 [N, 128]  (pad lanes are zero)

    logits = None
    for l in range(n_layers):
        w = w_ref[l]                     # bf16 [128, 128] (static index)
        b = b_ref[l:l + 1, :]            # f32  [1, 128]   (full lane row)

        # Module-order associativity: Â @ (H @ W), f32 accumulation on MXU.
        hw = jnp.dot(h, w, preferred_element_type=jnp.float32)
        out = jnp.dot(a, hw.astype(jnp.bfloat16),
                      preferred_element_type=jnp.float32) + b

        if l < n_layers - 1:
            # ReLU in f32 (v5e has no bf16 VPU); dropout(training=False) is
            # identity; re-round to bf16 only for the next MXU pass.  Pad
            # lanes stay exactly zero (zero W columns + zero bias).
            h = jnp.maximum(out, 0.0).astype(jnp.bfloat16)
        else:
            logits = out                 # f32 [N, 128]; pad lanes ≈ -1e30

    # Lane-dense log_softmax over all 128 lanes; pad lanes vanish via -1e30.
    m = jnp.max(logits, axis=-1, keepdims=True)
    z = logits - m
    lse = jnp.log(jnp.sum(jnp.exp(z), axis=-1, keepdims=True))
    out_ref[...] = z - lse


# ------------------------------ param packing ------------------------------ #
def build_packed_params(params):
    """Pack [(W1,b1),...,(W5,b5)] into lane-dense bf16 weight / f32 bias slabs."""
    n_layers = len(params)
    num_classes = params[-1][0].shape[1]
    assert num_classes <= LANES

    w_slab = jnp.zeros((n_layers, LANES, LANES), jnp.float32)
    b_slab = jnp.zeros((BIAS_ROWS, LANES), jnp.float32)
    for l, (w, b) in enumerate(params):
        f_in, f_out = w.shape
        assert f_in <= LANES and f_out <= LANES
        w_slab = w_slab.at[l, :f_in, :f_out].set(w)
        b_slab = b_slab.at[l, :f_out].set(b.reshape(-1))
    # Final layer: padded class lanes get a huge negative bias so they vanish
    # inside the lane-dense log_softmax.
    b_slab = b_slab.at[n_layers - 1, num_classes:].set(NEG_BIG)

    return w_slab.astype(jnp.bfloat16), b_slab


# ------------------------------ forward factory ----------------------------- #
def make_gcn_five(a_hat, params):
    """Packs parameters / casts Â ONCE; returns a jitted forward(x) closure."""
    n = a_hat.shape[0]
    n_layers = len(params)
    num_classes = params[-1][0].shape[1]

    # Hoisted out of the per-call path (perf review item #1).
    w_slab, b_slab = build_packed_params(params)
    a_bf16 = a_hat.astype(jnp.bfloat16)       # deliberate bf16 rounding of Â

    kernel = functools.partial(gcn5_kernel, n_layers=n_layers)
    vmem = pl.BlockSpec(memory_space=pltpu.MemorySpace.VMEM)

    cost = pl.CostEstimate(
        flops=n_layers * (2 * n * LANES * LANES + 2 * n * n * LANES),
        transcendentals=n * LANES + n,        # exp over logits + per-row log
        bytes_accessed=(n * n * 2 + n * LANES * 2            # Â + padded X
                        + n_layers * LANES * LANES * 2        # weight slab
                        + BIAS_ROWS * LANES * 4               # bias slab
                        + n * LANES * 4),                     # output
    )

    call = pl.pallas_call(
        kernel,
        out_shape=jax.ShapeDtypeStruct((n, LANES), jnp.float32),
        in_specs=[vmem, vmem, vmem, vmem],
        out_specs=vmem,
        cost_estimate=cost,
    )

    @jax.jit
    def forward(x):
        f_in0 = x.shape[1]
        x_pad = jnp.pad(x.astype(jnp.bfloat16),
                        ((0, 0), (0, LANES - f_in0)))         # [N, 128] bf16
        out_padded = call(a_bf16, x_pad, w_slab, b_slab)
        # Lane-dense kernel output -> slice to the real class count here.
        return out_padded[:, :num_classes]

    return forward


# ------------------------------ JAX references ------------------------------ #
def gcn_five_reference_f32(a_hat, x, params):
    """Pure-f32 reference matching the PyTorch module semantics (eval mode)."""
    h = x
    for i, (w, b) in enumerate(params):
        h = a_hat @ (h @ w) + b
        if i < len(params) - 1:
            h = jnp.maximum(h, 0.0)
    return jax.nn.log_softmax(h, axis=1)


def gcn_five_reference_matched(a_hat, x, params):
    """Reference with the same bf16-operand / f32-accumulate numerics."""
    a = a_hat.astype(jnp.bfloat16)
    h = x.astype(jnp.bfloat16)
    logits = None
    for l, (w, b) in enumerate(params):
        hw = jnp.dot(h, w.astype(jnp.bfloat16),
                     preferred_element_type=jnp.float32)
        out = jnp.dot(a, hw.astype(jnp.bfloat16),
                      preferred_element_type=jnp.float32) + b
        if l < len(params) - 1:
            h = jnp.maximum(out, 0.0).astype(jnp.bfloat16)
        else:
            logits = out
    return jax.nn.log_softmax(logits, axis=1)


# ------------------------------ setup helpers ------------------------------ #
def build_normalized_adjacency(edge_index, num_nodes):
    """Dense  Â = D^{-1/2}(A + I)D^{-1/2}  from an undirected edge list."""
    src, dst = edge_index[0], edge_index[1]
    adj = jnp.zeros((num_nodes, num_nodes), jnp.float32)
    adj = adj.at[src, dst].set(1.0)
    adj = adj.at[dst, src].set(1.0)                      # make undirected
    adj = adj + jnp.eye(num_nodes, dtype=jnp.float32)    # self-loops
    deg = jnp.sum(adj, axis=1)
    d_inv_sqrt = 1.0 / jnp.sqrt(deg)
    return adj * d_inv_sqrt[:, None] * d_inv_sqrt[None, :]


def glorot(key, fan_in, fan_out):
    limit = jnp.sqrt(6.0 / (fan_in + fan_out))
    return jax.random.uniform(key, (fan_in, fan_out), jnp.float32, -limit, limit)


# ---------------------------------- main ----------------------------------- #
if __name__ == "__main__":
    key = jax.random.PRNGKey(0)

    num_nodes = 64
    num_node_features = 8
    hidden = 16
    num_classes = 4
    num_edges = 128

    k_x, k_e, k1, k2, k3, k4, k5 = jax.random.split(key, 7)

    x = jax.random.normal(k_x, (num_nodes, num_node_features), jnp.float32)
    edge_index = jax.random.randint(k_e, (2, num_edges), 0, num_nodes)

    a_hat = build_normalized_adjacency(edge_index, num_nodes)

    dims = [num_node_features, hidden, hidden, hidden, hidden, num_classes]
    keys = [k1, k2, k3, k4, k5]
    params = []
    for i in range(5):
        w = glorot(keys[i], dims[i], dims[i + 1])
        b = jnp.zeros((1, dims[i + 1]), jnp.float32)     # (1, Fout) for broadcast
        params.append((w, b))

    # Pack params / cast Â once; per-call path is just pad(x) + pallas_call.
    gcn_five = make_gcn_five(a_hat, params)

    out = gcn_five(x)
    out = jax.block_until_ready(out)
    assert out.shape == (num_nodes, num_classes)

    # Tight check vs a reference with identical bf16-operand numerics.
    ref_matched = gcn_five_reference_matched(a_hat, x, params)
    assert jnp.allclose(out, ref_matched, atol=1e-3, rtol=1e-3), (
        "max |diff| vs matched ref = %e"
        % float(jnp.max(jnp.abs(out - ref_matched))))

    # Loose sanity check vs the pure-f32 module semantics (bf16 Â rounding only).
    ref_f32 = gcn_five_reference_f32(a_hat, x, params)
    assert jnp.allclose(out, ref_f32, atol=0.3), (
        "max |diff| vs f32 ref = %e"
        % float(jnp.max(jnp.abs(out - ref_f32))))

    print("KERNEL_OK")
</pallas_src>

<mosaic_0001>
module attributes {stable_mosaic.version = 11 : i64} {
  func.func @gcn5_kernel(%arg0: memref<64x64xbf16, #tpu.memory_space<vmem>>, %arg1: memref<64x128xbf16, #tpu.memory_space<vmem>>, %arg2: memref<5x128x128xbf16, #tpu.memory_space<vmem>>, %arg3: memref<8x128xf32, #tpu.memory_space<vmem>>, %arg4: memref<64x128xf32, #tpu.memory_space<vmem>>) attributes {dimension_semantics = [], scalar_prefetch = 0 : i64, scratch_operands = 0 : i64, tpu.core_type = #tpu.core_type<tc>} {
    %c0 = arith.constant 0 : index
    %c0_0 = arith.constant 0 : index
    %0 = vector.load %arg0[%c0, %c0_0] : memref<64x64xbf16, #tpu.memory_space<vmem>>, vector<64x64xbf16>
    %c0_1 = arith.constant 0 : index
    %c0_2 = arith.constant 0 : index
    %1 = vector.load %arg1[%c0_1, %c0_2] : memref<64x128xbf16, #tpu.memory_space<vmem>>, vector<64x128xbf16>
    %c0_3 = arith.constant 0 : index
    %c0_4 = arith.constant 0 : index
    %c0_5 = arith.constant 0 : index
    %2 = vector.load %arg2[%c0_3, %c0_4, %c0_5] : memref<5x128x128xbf16, #tpu.memory_space<vmem>>, vector<1x128x128xbf16>
    %3 = vector.shape_cast %2 : vector<1x128x128xbf16> to vector<128x128xbf16>
    %c0_6 = arith.constant 0 : index
    %c0_7 = arith.constant 0 : index
    %4 = vector.load %arg3[%c0_6, %c0_7] : memref<8x128xf32, #tpu.memory_space<vmem>>, vector<1x128xf32>
    %cst = arith.constant dense<0.000000e+00> : vector<64x128xf32>
    %5 = tpu.matmul %1, %3, %cst {dimension_numbers = #tpu.dot_dimension_numbers<[1], [0], [0], [1], [0, 0, 1, 1], [], []>} : vector<64x128xbf16>, vector<128x128xbf16>, vector<64x128xf32> -> vector<64x128xf32>
    %6 = arith.truncf %5 : vector<64x128xf32> to vector<64x128xbf16>
    %cst_8 = arith.constant dense<0.000000e+00> : vector<64x128xf32>
    %7 = tpu.matmul %0, %6, %cst_8 {dimension_numbers = #tpu.dot_dimension_numbers<[1], [0], [0], [1], [0, 0, 1, 1], [], []>} : vector<64x64xbf16>, vector<64x128xbf16>, vector<64x128xf32> -> vector<64x128xf32>
    %8 = vector.broadcast %4 : vector<1x128xf32> to vector<64x128xf32>
    %9 = arith.addf %7, %8 : vector<64x128xf32>
    %cst_9 = arith.constant 0.000000e+00 : f32
    %10 = vector.broadcast %cst_9 : f32 to vector<64x128xf32>
    %11 = arith.maximumf %9, %10 : vector<64x128xf32>
    %12 = arith.truncf %11 : vector<64x128xf32> to vector<64x128xbf16>
    %c1 = arith.constant 1 : index
    %c0_10 = arith.constant 0 : index
    %c0_11 = arith.constant 0 : index
    %13 = vector.load %arg2[%c1, %c0_10, %c0_11] : memref<5x128x128xbf16, #tpu.memory_space<vmem>>, vector<1x128x128xbf16>
    %14 = vector.shape_cast %13 : vector<1x128x128xbf16> to vector<128x128xbf16>
    %c1_12 = arith.constant 1 : index
    %c0_13 = arith.constant 0 : index
    %15 = vector.load %arg3[%c1_12, %c0_13] : memref<8x128xf32, #tpu.memory_space<vmem>>, vector<1x128xf32>
    %cst_14 = arith.constant dense<0.000000e+00> : vector<64x128xf32>
    %16 = tpu.matmul %12, %14, %cst_14 {dimension_numbers = #tpu.dot_dimension_numbers<[1], [0], [0], [1], [0, 0, 1, 1], [], []>} : vector<64x128xbf16>, vector<128x128xbf16>, vector<64x128xf32> -> vector<64x128xf32>
    %17 = arith.truncf %16 : vector<64x128xf32> to vector<64x128xbf16>
    %cst_15 = arith.constant dense<0.000000e+00> : vector<64x128xf32>
    %18 = tpu.matmul %0, %17, %cst_15 {dimension_numbers = #tpu.dot_dimension_numbers<[1], [0], [0], [1], [0, 0, 1, 1], [], []>} : vector<64x64xbf16>, vector<64x128xbf16>, vector<64x128xf32> -> vector<64x128xf32>
    %19 = vector.broadcast %15 : vector<1x128xf32> to vector<64x128xf32>
    %20 = arith.addf %18, %19 : vector<64x128xf32>
    %cst_16 = arith.constant 0.000000e+00 : f32
    %21 = vector.broadcast %cst_16 : f32 to vector<64x128xf32>
    %22 = arith.maximumf %20, %21 : vector<64x128xf32>
    %23 = arith.truncf %22 : vector<64x128xf32> to vector<64x128xbf16>
    %c2 = arith.constant 2 : index
    %c0_17 = arith.constant 0 : index
    %c0_18 = arith.constant 0 : index
    %24 = vector.load %arg2[%c2, %c0_17, %c0_18] : memref<5x128x128xbf16, #tpu.memory_space<vmem>>, vector<1x128x128xbf16>
    %25 = vector.shape_cast %24 : vector<1x128x128xbf16> to vector<128x128xbf16>
    %c2_19 = arith.constant 2 : index
    %c0_20 = arith.constant 0 : index
    %26 = vector.load %arg3[%c2_19, %c0_20] : memref<8x128xf32, #tpu.memory_space<vmem>>, vector<1x128xf32>
    %cst_21 = arith.constant dense<0.000000e+00> : vector<64x128xf32>
    %27 = tpu.matmul %23, %25, %cst_21 {dimension_numbers = #tpu.dot_dimension_numbers<[1], [0], [0], [1], [0, 0, 1, 1], [], []>} : vector<64x128xbf16>, vector<128x128xbf16>, vector<64x128xf32> -> vector<64x128xf32>
    %28 = arith.truncf %27 : vector<64x128xf32> to vector<64x128xbf16>
    %cst_22 = arith.constant dense<0.000000e+00> : vector<64x128xf32>
    %29 = tpu.matmul %0, %28, %cst_22 {dimension_numbers = #tpu.dot_dimension_numbers<[1], [0], [0], [1], [0, 0, 1, 1], [], []>} : vector<64x64xbf16>, vector<64x128xbf16>, vector<64x128xf32> -> vector<64x128xf32>
    %30 = vector.broadcast %26 : vector<1x128xf32> to vector<64x128xf32>
    %31 = arith.addf %29, %30 : vector<64x128xf32>
    %cst_23 = arith.constant 0.000000e+00 : f32
    %32 = vector.broadcast %cst_23 : f32 to vector<64x128xf32>
    %33 = arith.maximumf %31, %32 : vector<64x128xf32>
    %34 = arith.truncf %33 : vector<64x128xf32> to vector<64x128xbf16>
    %c3 = arith.constant 3 : index
    %c0_24 = arith.constant 0 : index
    %c0_25 = arith.constant 0 : index
    %35 = vector.load %arg2[%c3, %c0_24, %c0_25] : memref<5x128x128xbf16, #tpu.memory_space<vmem>>, vector<1x128x128xbf16>
    %36 = vector.shape_cast %35 : vector<1x128x128xbf16> to vector<128x128xbf16>
    %c3_26 = arith.constant 3 : index
    %c0_27 = arith.constant 0 : index
    %37 = vector.load %arg3[%c3_26, %c0_27] : memref<8x128xf32, #tpu.memory_space<vmem>>, vector<1x128xf32>
    %cst_28 = arith.constant dense<0.000000e+00> : vector<64x128xf32>
    %38 = tpu.matmul %34, %36, %cst_28 {dimension_numbers = #tpu.dot_dimension_numbers<[1], [0], [0], [1], [0, 0, 1, 1], [], []>} : vector<64x128xbf16>, vector<128x128xbf16>, vector<64x128xf32> -> vector<64x128xf32>
    %39 = arith.truncf %38 : vector<64x128xf32> to vector<64x128xbf16>
    %cst_29 = arith.constant dense<0.000000e+00> : vector<64x128xf32>
    %40 = tpu.matmul %0, %39, %cst_29 {dimension_numbers = #tpu.dot_dimension_numbers<[1], [0], [0], [1], [0, 0, 1, 1], [], []>} : vector<64x64xbf16>, vector<64x128xbf16>, vector<64x128xf32> -> vector<64x128xf32>
    %41 = vector.broadcast %37 : vector<1x128xf32> to vector<64x128xf32>
    %42 = arith.addf %40, %41 : vector<64x128xf32>
    %cst_30 = arith.constant 0.000000e+00 : f32
    %43 = vector.broadcast %cst_30 : f32 to vector<64x128xf32>
    %44 = arith.maximumf %42, %43 : vector<64x128xf32>
    %45 = arith.truncf %44 : vector<64x128xf32> to vector<64x128xbf16>
    %c4 = arith.constant 4 : index
    %c0_31 = arith.constant 0 : index
    %c0_32 = arith.constant 0 : index
    %46 = vector.load %arg2[%c4, %c0_31, %c0_32] : memref<5x128x128xbf16, #tpu.memory_space<vmem>>, vector<1x128x128xbf16>
    %47 = vector.shape_cast %46 : vector<1x128x128xbf16> to vector<128x128xbf16>
    %c4_33 = arith.constant 4 : index
    %c0_34 = arith.constant 0 : index
    %48 = vector.load %arg3[%c4_33, %c0_34] : memref<8x128xf32, #tpu.memory_space<vmem>>, vector<1x128xf32>
    %cst_35 = arith.constant dense<0.000000e+00> : vector<64x128xf32>
    %49 = tpu.matmul %45, %47, %cst_35 {dimension_numbers = #tpu.dot_dimension_numbers<[1], [0], [0], [1], [0, 0, 1, 1], [], []>} : vector<64x128xbf16>, vector<128x128xbf16>, vector<64x128xf32> -> vector<64x128xf32>
    %50 = arith.truncf %49 : vector<64x128xf32> to vector<64x128xbf16>
    %cst_36 = arith.constant dense<0.000000e+00> : vector<64x128xf32>
    %51 = tpu.matmul %0, %50, %cst_36 {dimension_numbers = #tpu.dot_dimension_numbers<[1], [0], [0], [1], [0, 0, 1, 1], [], []>} : vector<64x64xbf16>, vector<64x128xbf16>, vector<64x128xf32> -> vector<64x128xf32>
    %52 = vector.broadcast %48 : vector<1x128xf32> to vector<64x128xf32>
    %53 = arith.addf %51, %52 : vector<64x128xf32>
    %cst_37 = arith.constant dense<0xFF800000> : vector<64xf32>
    %54 = vector.multi_reduction <maximumf>, %53, %cst_37 [1] : vector<64x128xf32> to vector<64xf32>
    %55 = vector.shape_cast %54 : vector<64xf32> to vector<64x1xf32>
    %56 = vector.broadcast %55 : vector<64x1xf32> to vector<64x128xf32>
    %57 = arith.subf %53, %56 : vector<64x128xf32>
    %58 = math.exp %57 : vector<64x128xf32>
    %cst_38 = arith.constant dense<0.000000e+00> : vector<64xf32>
    %59 = vector.multi_reduction <add>, %58, %cst_38 [1] : vector<64x128xf32> to vector<64xf32>
    %60 = vector.shape_cast %59 : vector<64xf32> to vector<64x1xf32>
    %61 = math.log %60 : vector<64x1xf32>
    %62 = vector.broadcast %61 : vector<64x1xf32> to vector<64x128xf32>
    %63 = arith.subf %57, %62 : vector<64x128xf32>
    %c0_39 = arith.constant 0 : index
    %c0_40 = arith.constant 0 : index
    %64 = vector.load %arg4[%c0_39, %c0_40] : memref<64x128xf32, #tpu.memory_space<vmem>>, vector<64x128xf32>
    tpu.vector_store %arg4[%c0_39, %c0_40], %63 {strides = array<i32>} : memref<64x128xf32, #tpu.memory_space<vmem>>, vector<64x128xf32>,
    return
  }
}

</mosaic_0001>

<bundles_post_ra>
// kernel: forward.1
= control target key start
LH: loop header
LB: loop body
LE: loop exit
PB: predicated region body
PF: predicated region fallthrough
CT: control target
= control target key end

     0   :  { %9 = vsyncpa [#allocation3], 0  ;;  %s1743_s15 = smov [#allocation2]   ;;  %s1917_s0 = inlined_call_operand.vmem [shape: bf16[64,64], index: 0, kind: input, shape index: {}]   ;;  %s1918_s1 = inlined_call_operand.vmem [shape: bf16[64,128], index: 1, kind: input, shape index: {}]   ;;  %s1919_s2 = inlined_call_operand.hbm [shape: bf16[5,128,128], index: 2, kind: input, shape index: {}]   ;;  %s1920_s3 = inlined_call_operand.vmem [shape: f32[8,128], index: 3, kind: input, shape index: {}]   ;;  %s1921_s4 = inlined_call_operand.vmem [shape: f32[64,128], index: 4, kind: output, shape index: {}]  }
   0x1   :  { %s19_s16 = sshll.u32 %s1743_s15, 4  ;;  %s20_s16 = int_to_ptr.vmem [resolvable:$true] %s19_s16 }
   0x2   :  { %s1729_s17 = scalar_lea.vmem %s20_s16, 5120  ;;  %p1734_p1 = scmp.lt.s32.totalorder %s20_s16, %s20_s16 }
   0x3   :  { %p1730_p0 = scmp.ne.s32.totalorder %s20_s16, %s1729_s17  ;;  %p1735_p2 = scmp.lt.s32.totalorder %s1729_s17, %s1729_s17 }
   0x5   :  { %p1736_p3 = por %p1735_p2, %p1734_p1 }
   0x7   :  { %p1737_p4 = pnand %p1736_p3, %p1730_p0 }
   0x9   :  { %1740 = shalt.err (!%p1737_p4)
}
   0xa   :  { %s1744_s18 = smov 64   ;;  %s1745_s19 = smov 4  }
   0xb   :  { %25 = dma.hbm_to_vmem [thread:$0]  %s1919_s2, 5120, %s20_s16, [#allocation3], %s1744_s18, %s1744_s18, %s1745_s19  }
   0xc   :  { %1741 = dma.done.wait [#allocation3], 5120  }
   0xd   :  { %1742 = vsyncadd [#allocation3], 4294962176  ;;  %v1641_v0 = vld [vmem:[#allocation2 + $0x38] sm:$0xff]   ;;  %v1642_v1 = vld [vmem:[#allocation2 + $0x30] sm:$0xff]   ;;  %vm230_vm0 = vcmask 523264  }
   0xe   :  { %1438 = vmatprep.subr.bf16.mxu0 %v1641_v0  ;;  %v1643_v2 = vld [vmem:[#allocation2 + $0x28] sm:$0xff]   ;;  %v1644_v3 = vld [vmem:[#allocation2 + $0x20] sm:$0xff]   ;;  %v1645_v5 = vld [vmem:[#allocation2 + $0x18] sm:$0xff]  }
   0xf   :  { %1439 = vmatpush3.bf16.msra.mxu0 %v1641_v0  ;;  %v1649_v4 = vld [vmem:[%s1918_s1] sm:$0xff]   ;;  %v1646_v6 = vld [vmem:[#allocation2 + $0x10] sm:$0xff]   ;;  %v1647_v7 = vld [vmem:[#allocation2 + $0x8] sm:$0xff]  }
  0x10   :  { %1440 = vmatprep.subr.bf16.mxu0 %v1642_v1  ;;  %1454 = vmatprep.mubr.bf16.mxu0 %v1649_v4  ;;  %v1648_v8 = vld [vmem:[#allocation2] sm:$0xff]   ;;  %v1650_v9 = vld [vmem:[%s1918_s1 + $0x8] sm:$0xff]   ;;  %v1651_v10 = vld [vmem:[%s1918_s1 + $0x10] sm:$0xff]  }
  0x11   :  { %v1652_v11 = vld [vmem:[%s1918_s1 + $0x18] sm:$0xff]   ;;  %v1789_v12 = vld [vmem:[%s1917_s0] sm:$0xff]   ;;  %v1798_v26 = vld [vmem:[%s1917_s0 + $0x8] sm:$0xff]  }
  0x12   :  { %1470 = vmatprep.mubr.msk.bf16.mxu1 %vm230_vm0, %v1789_v12  ;;  %v1657_v25 = vld [vmem:[#allocation2 + $0x78] sm:$0xff]   ;;  %v1803_v27 = vld [vmem:[%s1917_s0 + $0x10] sm:$0xff]   ;;  %v1659_v29 = vld [vmem:[#allocation2 + $0x68] sm:$0xff]  }
  0x13   :  { %1441 = vmatpush3.bf16.msra.mxu0 %v1642_v1  ;;  %v1658_v28 = vld [vmem:[#allocation2 + $0x70] sm:$0xff]   ;;  %v1812_v30 = vld [vmem:[%s1917_s0 + $0x18] sm:$0xff]   ;;  %v1660_v31 = vld [vmem:[#allocation2 + $0x60] sm:$0xff]  }
  0x14   :  { %1442 = vmatprep.subr.bf16.mxu0 %v1643_v2  ;;  %v1661_v32 = vld [vmem:[#allocation2 + $0x58] sm:$0xff]   ;;  %v1662_v33 = vld [vmem:[#allocation2 + $0x50] sm:$0xff]   ;;  %v1663_v34 = vld [vmem:[#allocation2 + $0x48] sm:$0xff]  }
  0x15   :  { %v1664_v35 = vld [vmem:[#allocation2 + $0x40] sm:$0xff]  }
  0x16   :  { %v1277_v38 = vld [vmem:[%s1920_s3] ss:$0 sm:$0xff] }
  0x17   :  { %1443 = vmatpush3.bf16.msra.mxu0 %v1643_v2 }
  0x18   :  { %1444 = vmatprep.subr.bf16.mxu0 %v1644_v3 }
  0x1b   :  { %1445 = vmatpush3.bf16.msra.mxu0 %v1644_v3 }
  0x1c   :  { %1446 = vmatprep.subr.bf16.mxu0 %v1645_v5 }
  0x1f   :  { %1447 = vmatpush3.bf16.msra.mxu0 %v1645_v5 }
  0x20   :  { %1448 = vmatprep.subr.bf16.mxu0 %v1646_v6 }
  0x23   :  { %1449 = vmatpush3.bf16.msra.mxu0 %v1646_v6 }
  0x24   :  { %1450 = vmatprep.subr.bf16.mxu0 %v1647_v7 }
  0x27   :  { %1451 = vmatpush3.bf16.msra.mxu0 %v1647_v7 }
  0x28   :  { %1452 = vmatprep.subr.bf16.mxu0 %v1648_v8 }
  0x2b   :  { %1453 = vmatpush3.bf16.msra.mxu0 %v1648_v8 }
  0x2e   :  { %1455 = vmatmul.mubr.bf16.vlgmr.msra.gmra.mxu0 %v1650_v9 }
  0x2f   :  { %1458 = vmatprep.mubr.bf16.mxu0 %v1651_v10 }
  0x36   :  { %1459 = vmatmul.mubr.bf16.gmra.mxu0 %v1652_v11 }
  0x37   :  { %1510 = vmatprep.mubr.msk.bf16.mxu0 %vm230_vm0, %v1789_v12 }
  0xee   :  { %v1456_v13 = vpop.f32.mrf.mxu0 }
  0xf0   :  { %v171_v14 = vpop.f32.mrf.mxu0 }
  0xf2   :  { %v1457_v15 = vpop.f32.mrf.mxu0 }
  0xf3   :  { %v203_v23 = vpack.c.bf16 %v1457_v15, %v1456_v13  ;;  %v1666_v15 = vld [vmem:[#allocation2 + $0xb0] sm:$0xff]  }
  0xf4   :  { %v174_v16 = vpop.f32.mrf.mxu0 }
  0xf5   :  { %v202_v24 = vpack.c.bf16 %v174_v16, %v171_v14  ;;  %v1665_v14 = vld [vmem:[#allocation2 + $0xb8] sm:$0xff]   ;;  %v1667_v16 = vld [vmem:[#allocation2 + $0xa8] sm:$0xff]  }
  0xf6   :  { %v1460_v17 = vpop.f32.mrf.mxu0 }
  0xf8   :  { %v187_v18 = vpop.f32.mrf.mxu0 }
  0xfa   :  { %v1461_v19 = vpop.f32.mrf.mxu0 }
  0xfb   :  { %v205_v20 = vpack.c.bf16 %v1461_v19, %v1460_v17  ;;  %v1668_v17 = vld [vmem:[#allocation2 + $0xa0] sm:$0xff]   ;;  %v1670_v19 = vld [vmem:[#allocation2 + $0x90] sm:$0xff]  }
  0xfc   :  { %v190_v21 = vpop.f32.mrf.mxu0 }
  0xfd   :  { %v204_v22 = vpack.c.bf16 %v190_v21, %v187_v18  ;;  %1462 = vmatprep.subr.bf16.mxu1 %v205_v20  ;;  %v1669_v18 = vld [vmem:[#allocation2 + $0x98] sm:$0xff]   ;;  %v1672_v21 = vld [vmem:[#allocation2 + $0x80] sm:$0xff]  }
  0xfe   :  { %1463 = vmatpush3.bf16.msra.mxu1 %v205_v20  ;;  %v1671_v20 = vld [vmem:[#allocation2 + $0x88] sm:$0xff]  }
  0xff   :  { %1464 = vmatprep.subr.bf16.mxu1 %v204_v22 }
 0x102   :  { %1465 = vmatpush3.bf16.msra.mxu1 %v204_v22 }
 0x103   :  { %1466 = vmatprep.subr.bf16.mxu1 %v203_v23 }
 0x106   :  { %1467 = vmatpush3.bf16.msra.mxu1 %v203_v23 }
 0x107   :  { %1468 = vmatprep.subr.bf16.mxu1 %v202_v24 }
 0x10a   :  { %1469 = vmatpush3.bf16.msra.mxu1 %v202_v24  ;;  %v1294_v24 = vld [vmem:[%s1920_s3 + $0x1] ss:$0 sm:$0xff] }
 0x10b   :  { %1478 = vmatprep.subr.bf16.mxu1 %v1657_v25 }
 0x10d   :  { %1471 = vmatmul.mubr.msk.bf16.vlgmr.msra.gmra.mxu1 %vm230_vm0, %v1798_v26 }
 0x10e   :  { %1474 = vmatprep.mubr.msk.bf16.mxu1 %vm230_vm0, %v1803_v27  ;;  %1479 = vmatpush3.bf16.msra.mxu1 %v1657_v25 }
 0x10f   :  { %1480 = vmatprep.subr.bf16.mxu1 %v1658_v28 }
 0x112   :  { %1481 = vmatpush3.bf16.msra.mxu1 %v1658_v28 }
 0x113   :  { %1482 = vmatprep.subr.bf16.mxu1 %v1659_v29 }
 0x115   :  { %1475 = vmatmul.mubr.msk.bf16.gmra.mxu1 %vm230_vm0, %v1812_v30 }
 0x116   :  { %1483 = vmatpush3.bf16.msra.mxu1 %v1659_v29 }
 0x117   :  { %1484 = vmatprep.subr.bf16.mxu1 %v1660_v31 }
 0x11a   :  { %1485 = vmatpush3.bf16.msra.mxu1 %v1660_v31 }
 0x11b   :  { %1486 = vmatprep.subr.bf16.mxu1 %v1661_v32 }
 0x11e   :  { %1487 = vmatpush3.bf16.msra.mxu1 %v1661_v32 }
 0x11f   :  { %1488 = vmatprep.subr.bf16.mxu1 %v1662_v33 }
 0x122   :  { %1489 = vmatpush3.bf16.msra.mxu1 %v1662_v33 }
 0x123   :  { %1490 = vmatprep.subr.bf16.mxu1 %v1663_v34 }
 0x126   :  { %1491 = vmatpush3.bf16.msra.mxu1 %v1663_v34 }
 0x127   :  { %1492 = vmatprep.subr.bf16.mxu1 %v1664_v35 }
 0x12a   :  { %1493 = vmatpush3.bf16.msra.mxu1 %v1664_v35 }
 0x1cd   :  { %v1472_v36 = vpop.f32.mrf.mxu1 }
 0x1ce   :  { %v286_v42 = vadd.f32 %v1472_v36, %v1277_v38 }
 0x1cf   :  { %v277_v37 = vpop.f32.mrf.mxu1 }
 0x1d0   :  { %v278_v40 = vadd.f32 %v1277_v38, %v277_v37  ;;  %v310_v49 = vmax.f32 %v286_v42, 0.0 }
 0x1d1   :  { %v1473_v39 = vpop.f32.mrf.mxu1 }
 0x1d2   :  { %v289_v41 = vadd.f32 %v1473_v39, %v1277_v38  ;;  %v308_v47 = vmax.f32 %v278_v40, 0.0 }
 0x1d3   :  { %v280_v43 = vpop.f32.mrf.mxu1 }
 0x1d4   :  { %v281_v44 = vadd.f32 %v1277_v38, %v280_v43  ;;  %v311_v45 = vmax.f32 %v289_v41, 0.0 }
 0x1d5   :  { %v1476_v46 = vpop.f32.mrf.mxu1 }
 0x1d6   :  { %v309_v48 = vmax.f32 %v281_v44, 0.0  ;;  %v317_v52 = vpack.c.bf16 %v311_v45, %v310_v49  ;;  %v302_v56 = vadd.f32 %v1476_v46, %v1277_v38 }
 0x1d7   :  { %v293_v50 = vpop.f32.mrf.mxu1 }
 0x1d8   :  { %v316_v51 = vpack.c.bf16 %v309_v48, %v308_v47  ;;  %v294_v54 = vadd.f32 %v1277_v38, %v293_v50  ;;  %v314_v62 = vmax.f32 %v302_v56, 0.0 }
 0x1d9   :  { %v1477_v53 = vpop.f32.mrf.mxu1 }
 0x1da   :  { %v305_v55 = vadd.f32 %v1477_v53, %v1277_v38  ;;  %1494 = vmatprep.mubr.bf16.mxu1 %v316_v51  ;;  %v312_v60 = vmax.f32 %v294_v54, 0.0 }
 0x1db   :  { %v296_v57 = vpop.f32.mrf.mxu1  ;;  %1495 = vmatmul.mubr.bf16.vlgmr.msra.gmra.mxu1 %v317_v52 }
 0x1dc   :  { %v297_v58 = vadd.f32 %v1277_v38, %v296_v57  ;;  %v315_v59 = vmax.f32 %v305_v55, 0.0 }
 0x1de   :  { %v313_v61 = vmax.f32 %v297_v58, 0.0  ;;  %v319_v0 = vpack.c.bf16 %v315_v59, %v314_v62 }
 0x1e0   :  { %v318_v63 = vpack.c.bf16 %v313_v61, %v312_v60 }
 0x1e2   :  { %1498 = vmatprep.mubr.bf16.mxu1 %v318_v63 }
 0x1e3   :  { %1499 = vmatmul.mubr.bf16.gmra.mxu1 %v319_v0 }
 0x1e4   :  { %1550 = vmatprep.mubr.msk.bf16.mxu1 %vm230_vm0, %v1789_v12 }
 0x29b   :  { %v1496_v1 = vpop.f32.mrf.mxu1 }
 0x29d   :  { %v420_v2 = vpop.f32.mrf.mxu1 }
 0x29f   :  { %v1497_v3 = vpop.f32.mrf.mxu1 }
 0x2a0   :  { %v452_v11 = vpack.c.bf16 %v1497_v3, %v1496_v1  ;;  %v1674_v3 = vld [vmem:[#allocation2 + $0xf0] sm:$0xff]  }
 0x2a1   :  { %v423_v4 = vpop.f32.mrf.mxu1 }
 0x2a2   :  { %v451_v13 = vpack.c.bf16 %v423_v4, %v420_v2  ;;  %v1673_v2 = vld [vmem:[#allocation2 + $0xf8] sm:$0xff]   ;;  %v1675_v4 = vld [vmem:[#allocation2 + $0xe8] sm:$0xff]  }
 0x2a3   :  { %v1500_v5 = vpop.f32.mrf.mxu1 }
 0x2a5   :  { %v436_v6 = vpop.f32.mrf.mxu1 }
 0x2a7   :  { %v1501_v7 = vpop.f32.mrf.mxu1 }
 0x2a8   :  { %v454_v8 = vpack.c.bf16 %v1501_v7, %v1500_v5  ;;  %v1676_v5 = vld [vmem:[#allocation2 + $0xe0] sm:$0xff]   ;;  %v1678_v7 = vld [vmem:[#allocation2 + $0xd0] sm:$0xff]  }
 0x2a9   :  { %v439_v9 = vpop.f32.mrf.mxu1 }
 0x2aa   :  { %v453_v10 = vpack.c.bf16 %v439_v9, %v436_v6  ;;  %1502 = vmatprep.subr.bf16.mxu0 %v454_v8  ;;  %v1677_v6 = vld [vmem:[#allocation2 + $0xd8] sm:$0xff]   ;;  %v1680_v9 = vld [vmem:[#allocation2 + $0xc0] sm:$0xff]  }
 0x2ab   :  { %1503 = vmatpush3.bf16.msra.mxu0 %v454_v8  ;;  %v1679_v8 = vld [vmem:[#allocation2 + $0xc8] sm:$0xff]  }
 0x2ac   :  { %1504 = vmatprep.subr.bf16.mxu0 %v453_v10 }
 0x2af   :  { %1505 = vmatpush3.bf16.msra.mxu0 %v453_v10 }
 0x2b0   :  { %1506 = vmatprep.subr.bf16.mxu0 %v452_v11 }
 0x2b3   :  { %1507 = vmatpush3.bf16.msra.mxu0 %v452_v11 }
 0x2b4   :  { %1508 = vmatprep.subr.bf16.mxu0 %v451_v13 }
 0x2b7   :  { %1509 = vmatpush3.bf16.msra.mxu0 %v451_v13  ;;  %v1307_v13 = vld [vmem:[%s1920_s3 + $0x2] ss:$0 sm:$0xff] }
 0x2b8   :  { %1518 = vmatprep.subr.bf16.mxu0 %v1665_v14 }
 0x2ba   :  { %1511 = vmatmul.mubr.msk.bf16.vlgmr.msra.gmra.mxu0 %vm230_vm0, %v1798_v26 }
 0x2bb   :  { %1514 = vmatprep.mubr.msk.bf16.mxu0 %vm230_vm0, %v1803_v27  ;;  %1519 = vmatpush3.bf16.msra.mxu0 %v1665_v14 }
 0x2bc   :  { %1520 = vmatprep.subr.bf16.mxu0 %v1666_v15 }
 0x2bf   :  { %1521 = vmatpush3.bf16.msra.mxu0 %v1666_v15 }
 0x2c0   :  { %1522 = vmatprep.subr.bf16.mxu0 %v1667_v16 }
 0x2c2   :  { %1515 = vmatmul.mubr.msk.bf16.gmra.mxu0 %vm230_vm0, %v1812_v30 }
 0x2c3   :  { %1523 = vmatpush3.bf16.msra.mxu0 %v1667_v16 }
 0x2c4   :  { %1524 = vmatprep.subr.bf16.mxu0 %v1668_v17 }
 0x2c7   :  { %1525 = vmatpush3.bf16.msra.mxu0 %v1668_v17 }
 0x2c8   :  { %1526 = vmatprep.subr.bf16.mxu0 %v1669_v18 }
 0x2cb   :  { %1527 = vmatpush3.bf16.msra.mxu0 %v1669_v18 }
 0x2cc   :  { %1528 = vmatprep.subr.bf16.mxu0 %v1670_v19 }
 0x2cf   :  { %1529 = vmatpush3.bf16.msra.mxu0 %v1670_v19 }
 0x2d0   :  { %1530 = vmatprep.subr.bf16.mxu0 %v1671_v20 }
 0x2d3   :  { %1531 = vmatpush3.bf16.msra.mxu0 %v1671_v20 }
 0x2d4   :  { %1532 = vmatprep.subr.bf16.mxu0 %v1672_v21 }
 0x2d7   :  { %1533 = vmatpush3.bf16.msra.mxu0 %v1672_v21 }
 0x37a   :  { %v1512_v22 = vpop.f32.mrf.mxu0 }
 0x37b   :  { %v502_v31 = vadd.f32 %v1512_v22, %v1294_v24 }
 0x37c   :  { %v493_v23 = vpop.f32.mrf.mxu0 }
 0x37d   :  { %v494_v28 = vadd.f32 %v1294_v24, %v493_v23  ;;  %v526_v38 = vmax.f32 %v502_v31, 0.0 }
 0x37e   :  { %v1513_v25 = vpop.f32.mrf.mxu0 }
 0x37f   :  { %v505_v29 = vadd.f32 %v1513_v25, %v1294_v24  ;;  %v524_v36 = vmax.f32 %v494_v28, 0.0 }
 0x380   :  { %v496_v32 = vpop.f32.mrf.mxu0 }
 0x381   :  { %v497_v33 = vadd.f32 %v1294_v24, %v496_v32  ;;  %v527_v34 = vmax.f32 %v505_v29, 0.0 }
 0x382   :  { %v1516_v35 = vpop.f32.mrf.mxu0 }
 0x383   :  { %v525_v37 = vmax.f32 %v497_v33, 0.0  ;;  %v533_v41 = vpack.c.bf16 %v527_v34, %v526_v38  ;;  %v518_v45 = vadd.f32 %v1516_v35, %v1294_v24 }
 0x384   :  { %v509_v39 = vpop.f32.mrf.mxu0 }
 0x385   :  { %v532_v40 = vpack.c.bf16 %v525_v37, %v524_v36  ;;  %v510_v43 = vadd.f32 %v1294_v24, %v509_v39  ;;  %v530_v51 = vmax.f32 %v518_v45, 0.0 }
 0x386   :  { %v1517_v42 = vpop.f32.mrf.mxu0 }
 0x387   :  { %v521_v44 = vadd.f32 %v1517_v42, %v1294_v24  ;;  %1534 = vmatprep.mubr.bf16.mxu0 %v532_v40  ;;  %v528_v49 = vmax.f32 %v510_v43, 0.0 }
 0x388   :  { %v512_v46 = vpop.f32.mrf.mxu0  ;;  %1535 = vmatmul.mubr.bf16.vlgmr.msra.gmra.mxu0 %v533_v41 }
 0x389   :  { %v513_v47 = vadd.f32 %v1294_v24, %v512_v46  ;;  %v531_v48 = vmax.f32 %v521_v44, 0.0 }
 0x38b   :  { %v529_v50 = vmax.f32 %v513_v47, 0.0  ;;  %v535_v53 = vpack.c.bf16 %v531_v48, %v530_v51 }
 0x38d   :  { %v534_v52 = vpack.c.bf16 %v529_v50, %v528_v49 }
 0x38f   :  { %1538 = vmatprep.mubr.bf16.mxu0 %v534_v52 }
 0x390   :  { %1539 = vmatmul.mubr.bf16.gmra.mxu0 %v535_v53 }
 0x391   :  { %1590 = vmatprep.mubr.msk.bf16.mxu0 %vm230_vm0, %v1789_v12 }
 0x448   :  { %v1536_v54 = vpop.f32.mrf.mxu0 }
 0x44a   :  { %v636_v55 = vpop.f32.mrf.mxu0 }
 0x44c   :  { %v1537_v56 = vpop.f32.mrf.mxu0 }
 0x44d   :  { %v668_v0 = vpack.c.bf16 %v1537_v56, %v1536_v54  ;;  %v1683_v56 = vld [vmem:[#allocation2 + $0x128] sm:$0xff]  }
 0x44e   :  { %v639_v57 = vpop.f32.mrf.mxu0 }
 0x44f   :  { %v667_v1 = vpack.c.bf16 %v639_v57, %v636_v55  ;;  %v1682_v55 = vld [vmem:[#allocation2 + $0x130] sm:$0xff]   ;;  %v1684_v57 = vld [vmem:[#allocation2 + $0x120] sm:$0xff]  }
 0x450   :  { %v1540_v58 = vpop.f32.mrf.mxu0 }
 0x452   :  { %v652_v59 = vpop.f32.mrf.mxu0 }
 0x454   :  { %v1541_v60 = vpop.f32.mrf.mxu0 }
 0x455   :  { %v670_v61 = vpack.c.bf16 %v1541_v60, %v1540_v58  ;;  %v1685_v58 = vld [vmem:[#allocation2 + $0x118] sm:$0xff]   ;;  %v1687_v60 = vld [vmem:[#allocation2 + $0x108] sm:$0xff]  }
 0x456   :  { %v655_v62 = vpop.f32.mrf.mxu0 }
 0x457   :  { %v669_v63 = vpack.c.bf16 %v655_v62, %v652_v59  ;;  %1542 = vmatprep.subr.bf16.mxu1 %v670_v61  ;;  %v1686_v59 = vld [vmem:[#allocation2 + $0x110] sm:$0xff]  }
 0x458   :  { %1543 = vmatpush3.bf16.msra.mxu1 %v670_v61  ;;  %v1688_v61 = vld [vmem:[#allocation2 + $0x100] sm:$0xff]  }
 0x459   :  { %1544 = vmatprep.subr.bf16.mxu1 %v669_v63 }
 0x45c   :  { %1545 = vmatpush3.bf16.msra.mxu1 %v669_v63 }
 0x45d   :  { %1546 = vmatprep.subr.bf16.mxu1 %v668_v0 }
 0x460   :  { %1547 = vmatpush3.bf16.msra.mxu1 %v668_v0  ;;  %v1320_v0 = vld [vmem:[%s1920_s3 + $0x3] ss:$0 sm:$0xff] }
 0x461   :  { %1548 = vmatprep.subr.bf16.mxu1 %v667_v1 }
 0x464   :  { %1549 = vmatpush3.bf16.msra.mxu1 %v667_v1 }
 0x465   :  { %1558 = vmatprep.subr.bf16.mxu1 %v1673_v2 }
 0x467   :  { %1551 = vmatmul.mubr.msk.bf16.vlgmr.msra.gmra.mxu1 %vm230_vm0, %v1798_v26 }
 0x468   :  { %1554 = vmatprep.mubr.msk.bf16.mxu1 %vm230_vm0, %v1803_v27  ;;  %1559 = vmatpush3.bf16.msra.mxu1 %v1673_v2 }
 0x469   :  { %1560 = vmatprep.subr.bf16.mxu1 %v1674_v3 }
 0x46c   :  { %1561 = vmatpush3.bf16.msra.mxu1 %v1674_v3 }
 0x46d   :  { %1562 = vmatprep.subr.bf16.mxu1 %v1675_v4 }
 0x46f   :  { %1555 = vmatmul.mubr.msk.bf16.gmra.mxu1 %vm230_vm0, %v1812_v30 }
 0x470   :  { %1563 = vmatpush3.bf16.msra.mxu1 %v1675_v4 }
 0x471   :  { %1564 = vmatprep.subr.bf16.mxu1 %v1676_v5 }
 0x474   :  { %1565 = vmatpush3.bf16.msra.mxu1 %v1676_v5 }
 0x475   :  { %1566 = vmatprep.subr.bf16.mxu1 %v1677_v6 }
 0x478   :  { %1567 = vmatpush3.bf16.msra.mxu1 %v1677_v6 }
 0x479   :  { %1568 = vmatprep.subr.bf16.mxu1 %v1678_v7 }
 0x47c   :  { %1569 = vmatpush3.bf16.msra.mxu1 %v1678_v7 }
 0x47d   :  { %1570 = vmatprep.subr.bf16.mxu1 %v1679_v8 }
 0x480   :  { %1571 = vmatpush3.bf16.msra.mxu1 %v1679_v8 }
 0x481   :  { %1572 = vmatprep.subr.bf16.mxu1 %v1680_v9 }
 0x484   :  { %1573 = vmatpush3.bf16.msra.mxu1 %v1680_v9 }
 0x527   :  { %v1552_v10 = vpop.f32.mrf.mxu1 }
 0x528   :  { %v718_v17 = vadd.f32 %v1552_v10, %v1307_v13 }
 0x529   :  { %v709_v11 = vpop.f32.mrf.mxu1 }
 0x52a   :  { %v710_v15 = vadd.f32 %v1307_v13, %v709_v11  ;;  %v742_v24 = vmax.f32 %v718_v17, 0.0 }
 0x52b   :  { %v1553_v14 = vpop.f32.mrf.mxu1 }
 0x52c   :  { %v721_v16 = vadd.f32 %v1553_v14, %v1307_v13  ;;  %v740_v22 = vmax.f32 %v710_v15, 0.0 }
 0x52d   :  { %v712_v18 = vpop.f32.mrf.mxu1 }
 0x52e   :  { %v713_v19 = vadd.f32 %v1307_v13, %v712_v18  ;;  %v743_v20 = vmax.f32 %v721_v16, 0.0 }
 0x52f   :  { %v1556_v21 = vpop.f32.mrf.mxu1 }
 0x530   :  { %v741_v23 = vmax.f32 %v713_v19, 0.0  ;;  %v749_v29 = vpack.c.bf16 %v743_v20, %v742_v24  ;;  %v734_v34 = vadd.f32 %v1556_v21, %v1307_v13 }
 0x531   :  { %v725_v25 = vpop.f32.mrf.mxu1 }
 0x532   :  { %v748_v28 = vpack.c.bf16 %v741_v23, %v740_v22  ;;  %v726_v32 = vadd.f32 %v1307_v13, %v725_v25  ;;  %v746_v40 = vmax.f32 %v734_v34, 0.0 }
 0x533   :  { %v1557_v31 = vpop.f32.mrf.mxu1 }
 0x534   :  { %v737_v33 = vadd.f32 %v1557_v31, %v1307_v13  ;;  %1574 = vmatprep.mubr.bf16.mxu1 %v748_v28  ;;  %v744_v38 = vmax.f32 %v726_v32, 0.0 }
 0x535   :  { %v728_v35 = vpop.f32.mrf.mxu1  ;;  %1575 = vmatmul.mubr.bf16.vlgmr.msra.gmra.mxu1 %v749_v29 }
 0x536   :  { %v729_v36 = vadd.f32 %v1307_v13, %v728_v35  ;;  %v747_v37 = vmax.f32 %v737_v33, 0.0 }
 0x538   :  { %v745_v39 = vmax.f32 %v729_v36, 0.0  ;;  %v751_v42 = vpack.c.bf16 %v747_v37, %v746_v40 }
 0x53a   :  { %v750_v41 = vpack.c.bf16 %v745_v39, %v744_v38 }
 0x53c   :  { %1578 = vmatprep.mubr.bf16.mxu1 %v750_v41 }
 0x53d   :  { %1579 = vmatmul.mubr.bf16.gmra.mxu1 %v751_v42 }
 0x53e   :  { %1630 = vmatprep.mubr.msk.bf16.mxu1 %vm230_vm0, %v1789_v12  ;;  %v1681_v12 = vld [vmem:[#allocation2 + $0x138] sm:$0xff]  }
 0x5f5   :  { %v1576_v43 = vpop.f32.mrf.mxu1 }
 0x5f7   :  { %v852_v44 = vpop.f32.mrf.mxu1 }
 0x5f9   :  { %v1577_v45 = vpop.f32.mrf.mxu1 }
 0x5fa   :  { %v884_v53 = vpack.c.bf16 %v1577_v45, %v1576_v43  ;;  %v1333_v43 = vld [vmem:[%s1920_s3 + $0x4] ss:$0 sm:$0xff] }
 0x5fb   :  { %v855_v46 = vpop.f32.mrf.mxu1 }
 0x5fc   :  { %v883_v54 = vpack.c.bf16 %v855_v46, %v852_v44 }
 0x5fd   :  { %v1580_v47 = vpop.f32.mrf.mxu1 }
 0x5ff   :  { %v868_v48 = vpop.f32.mrf.mxu1 }
 0x601   :  { %v1581_v49 = vpop.f32.mrf.mxu1 }
 0x602   :  { %v886_v50 = vpack.c.bf16 %v1581_v49, %v1580_v47 }
 0x603   :  { %v871_v51 = vpop.f32.mrf.mxu1 }
 0x604   :  { %v885_v52 = vpack.c.bf16 %v871_v51, %v868_v48  ;;  %1582 = vmatprep.subr.bf16.mxu0 %v886_v50 }
 0x605   :  { %1583 = vmatpush3.bf16.msra.mxu0 %v886_v50 }
 0x606   :  { %1584 = vmatprep.subr.bf16.mxu0 %v885_v52 }
 0x609   :  { %1585 = vmatpush3.bf16.msra.mxu0 %v885_v52 }
 0x60a   :  { %1586 = vmatprep.subr.bf16.mxu0 %v884_v53 }
 0x60d   :  { %1587 = vmatpush3.bf16.msra.mxu0 %v884_v53 }
 0x60e   :  { %1588 = vmatprep.subr.bf16.mxu0 %v883_v54 }
 0x611   :  { %1589 = vmatpush3.bf16.msra.mxu0 %v883_v54 }
 0x612   :  { %1598 = vmatprep.subr.bf16.mxu0 %v1681_v12 }
 0x614   :  { %1591 = vmatmul.mubr.msk.bf16.vlgmr.msra.gmra.mxu0 %vm230_vm0, %v1798_v26 }
 0x615   :  { %1594 = vmatprep.mubr.msk.bf16.mxu0 %vm230_vm0, %v1803_v27  ;;  %1599 = vmatpush3.bf16.msra.mxu0 %v1681_v12 }
 0x616   :  { %1600 = vmatprep.subr.bf16.mxu0 %v1682_v55 }
 0x619   :  { %1601 = vmatpush3.bf16.msra.mxu0 %v1682_v55 }
 0x61a   :  { %1602 = vmatprep.subr.bf16.mxu0 %v1683_v56 }
 0x61c   :  { %1595 = vmatmul.mubr.msk.bf16.gmra.mxu0 %vm230_vm0, %v1812_v30 }
 0x61d   :  { %1603 = vmatpush3.bf16.msra.mxu0 %v1683_v56 }
 0x61e   :  { %1604 = vmatprep.subr.bf16.mxu0 %v1684_v57 }
 0x621   :  { %1605 = vmatpush3.bf16.msra.mxu0 %v1684_v57 }
 0x622   :  { %1606 = vmatprep.subr.bf16.mxu0 %v1685_v58 }
 0x625   :  { %1607 = vmatpush3.bf16.msra.mxu0 %v1685_v58 }
 0x626   :  { %1608 = vmatprep.subr.bf16.mxu0 %v1686_v59 }
 0x629   :  { %1609 = vmatpush3.bf16.msra.mxu0 %v1686_v59 }
 0x62a   :  { %1610 = vmatprep.subr.bf16.mxu0 %v1687_v60 }
 0x62d   :  { %1611 = vmatpush3.bf16.msra.mxu0 %v1687_v60 }
 0x62e   :  { %1612 = vmatprep.subr.bf16.mxu0 %v1688_v61 }
 0x631   :  { %1613 = vmatpush3.bf16.msra.mxu0 %v1688_v61 }
 0x6d4   :  { %v1592_v62 = vpop.f32.mrf.mxu0 }
 0x6d5   :  { %v934_v4 = vadd.f32 %v1592_v62, %v1320_v0 }
 0x6d6   :  { %v925_v63 = vpop.f32.mrf.mxu0 }
 0x6d7   :  { %v926_v2 = vadd.f32 %v1320_v0, %v925_v63  ;;  %v958_v11 = vmax.f32 %v934_v4, 0.0 }
 0x6d8   :  { %v1593_v1 = vpop.f32.mrf.mxu0 }
 0x6d9   :  { %v937_v3 = vadd.f32 %v1593_v1, %v1320_v0  ;;  %v956_v9 = vmax.f32 %v926_v2, 0.0 }
 0x6da   :  { %v928_v5 = vpop.f32.mrf.mxu0 }
 0x6db   :  { %v929_v6 = vadd.f32 %v1320_v0, %v928_v5  ;;  %v959_v7 = vmax.f32 %v937_v3, 0.0 }
 0x6dc   :  { %v1596_v8 = vpop.f32.mrf.mxu0 }
 0x6dd   :  { %v957_v10 = vmax.f32 %v929_v6, 0.0  ;;  %v965_v15 = vpack.c.bf16 %v959_v7, %v958_v11  ;;  %v950_v19 = vadd.f32 %v1596_v8, %v1320_v0 }
 0x6de   :  { %v941_v13 = vpop.f32.mrf.mxu0 }
 0x6df   :  { %v964_v14 = vpack.c.bf16 %v957_v10, %v956_v9  ;;  %v942_v17 = vadd.f32 %v1320_v0, %v941_v13  ;;  %v962_v25 = vmax.f32 %v950_v19, 0.0 }
 0x6e0   :  { %v1597_v16 = vpop.f32.mrf.mxu0 }
 0x6e1   :  { %v953_v18 = vadd.f32 %v1597_v16, %v1320_v0  ;;  %1614 = vmatprep.mubr.bf16.mxu0 %v964_v14  ;;  %v960_v23 = vmax.f32 %v942_v17, 0.0 }
 0x6e2   :  { %v944_v20 = vpop.f32.mrf.mxu0  ;;  %1615 = vmatmul.mubr.bf16.vlgmr.msra.gmra.mxu0 %v965_v15 }
 0x6e3   :  { %v945_v21 = vadd.f32 %v1320_v0, %v944_v20  ;;  %v963_v22 = vmax.f32 %v953_v18, 0.0 }
 0x6e5   :  { %v961_v24 = vmax.f32 %v945_v21, 0.0  ;;  %v967_v29 = vpack.c.bf16 %v963_v22, %v962_v25 }
 0x6e7   :  { %v966_v28 = vpack.c.bf16 %v961_v24, %v960_v23 }
 0x6e9   :  { %1618 = vmatprep.mubr.bf16.mxu0 %v966_v28 }
 0x6ea   :  { %1619 = vmatmul.mubr.bf16.gmra.mxu0 %v967_v29 }
 0x7a2   :  { %v1616_v31 = vpop.f32.mrf.mxu0 }
 0x7a4   :  { %v1068_v32 = vpop.f32.mrf.mxu0 }
 0x7a6   :  { %v1617_v33 = vpop.f32.mrf.mxu0 }
 0x7a7   :  { %v1100_v41 = vpack.c.bf16 %v1617_v33, %v1616_v31 }
 0x7a8   :  { %v1071_v34 = vpop.f32.mrf.mxu0 }
 0x7a9   :  { %v1099_v42 = vpack.c.bf16 %v1071_v34, %v1068_v32 }
 0x7aa   :  { %v1620_v35 = vpop.f32.mrf.mxu0 }
 0x7ac   :  { %v1084_v36 = vpop.f32.mrf.mxu0 }
 0x7ae   :  { %v1621_v37 = vpop.f32.mrf.mxu0 }
 0x7af   :  { %v1102_v38 = vpack.c.bf16 %v1621_v37, %v1620_v35 }
 0x7b0   :  { %v1087_v39 = vpop.f32.mrf.mxu0 }
 0x7b1   :  { %v1101_v40 = vpack.c.bf16 %v1087_v39, %v1084_v36  ;;  %1622 = vmatprep.subr.bf16.mxu1 %v1102_v38 }
 0x7b2   :  { %1623 = vmatpush3.bf16.msra.mxu1 %v1102_v38 }
 0x7b3   :  { %1624 = vmatprep.subr.bf16.mxu1 %v1101_v40 }
 0x7b6   :  { %1625 = vmatpush3.bf16.msra.mxu1 %v1101_v40 }
 0x7b7   :  { %1626 = vmatprep.subr.bf16.mxu1 %v1100_v41 }
 0x7ba   :  { %1627 = vmatpush3.bf16.msra.mxu1 %v1100_v41 }
 0x7bb   :  { %1628 = vmatprep.subr.bf16.mxu1 %v1099_v42 }
 0x7be   :  { %1629 = vmatpush3.bf16.msra.mxu1 %v1099_v42 }
 0x7c1   :  { %1631 = vmatmul.mubr.msk.bf16.vlgmr.msra.gmra.mxu1 %vm230_vm0, %v1798_v26 }
 0x7c2   :  { %1634 = vmatprep.mubr.msk.bf16.mxu1 %vm230_vm0, %v1803_v27 }
 0x7c9   :  { %1635 = vmatmul.mubr.msk.bf16.gmra.mxu1 %vm230_vm0, %v1812_v30 }
 0x881   :  { %v1632_v44 = vpop.f32.mrf.mxu1 }
 0x882   :  { %v1150_v45 = vadd.f32 %v1632_v44, %v1333_v43 }
 0x883   :  { %v1141_v46 = vpop.f32.mrf.mxu1 }
 0x884   :  { %v1142_v47 = vadd.f32 %v1333_v43, %v1141_v46  ;;  %1176 = vmax.xlane.f32.xlu1 %v1150_v45 }
 0x885   :  { %v1633_v48 = vpop.f32.mrf.mxu1 }
 0x886   :  { %v1153_v49 = vadd.f32 %v1633_v48, %v1333_v43  ;;  %1172 = vmax.xlane.f32.xlu0 %v1142_v47 }
 0x887   :  { %v1144_v50 = vpop.f32.mrf.mxu1 }
 0x888   :  { %v1145_v26 = vadd.f32 %v1333_v43, %v1144_v50  ;;  %1178 = vmax.xlane.f32.xlu1 %v1153_v49 }
 0x889   :  { %v1636_v51 = vpop.f32.mrf.mxu1 }
 0x88a   :  { %1174 = vmax.xlane.f32.xlu0 %v1145_v26  ;;  %v1166_v54 = vadd.f32 %v1636_v51, %v1333_v43 }
 0x88b   :  { %v1157_v27 = vpop.f32.mrf.mxu1 }
 0x88c   :  { %v1158_v52 = vadd.f32 %v1333_v43, %v1157_v27 }
 0x88d   :  { %v1637_v30 = vpop.f32.mrf.mxu1 }
 0x88e   :  { %1180 = vmax.xlane.f32.xlu0 %v1158_v52  ;;  %v1169_v55 = vadd.f32 %v1637_v30, %v1333_v43 }
 0x88f   :  { %v1160_v53 = vpop.f32.mrf.mxu1 }
 0x890   :  { %v1161_v12 = vadd.f32 %v1333_v43, %v1160_v53 }
 0x892   :  { %1182 = vmax.xlane.f32.xlu1 %v1161_v12  ;;  %1184 = vmax.xlane.f32.xlu0 %v1166_v54 }
 0x896   :  { %1186 = vmax.xlane.f32.xlu1 %v1169_v55 }
 0x90d   :  { %v1177_v56 = vpop.xlane.xlu1 %1176 }
 0x90e   :  { %v1861_v57 = vsub.f32 %v1150_v45, %v1177_v56 }
 0x90f   :  { %v1173_v58 = vpop.xlane.xlu0 %1172 }
 0x910   :  { %v1200_v59 = vmul.f32 1.442695, %v1861_v57  ;;  %v1864_v60 = vsub.f32 %v1142_v47, %v1173_v58 }
 0x911   :  { %v1179_v61 = vpop.xlane.xlu1 %1178 }
 0x912   :  { %1689 = vpow2.f32 %v1200_v59  ;;  %v1196_v62 = vmul.f32 1.442695, %v1864_v60  ;;  %v1867_v63 = vsub.f32 %v1153_v49, %v1179_v61 }
 0x913   :  { %v1175_v0 = vpop.xlane.xlu0 %1174 }
 0x914   :  { %v1202_v1 = vmul.f32 1.442695, %v1867_v63  ;;  %v1870_v2 = vsub.f32 %v1145_v26, %v1175_v0  ;;  %1691 = vpow2.f32 %v1196_v62 }
 0x916   :  { %1693 = vpow2.f32 %v1202_v1  ;;  %v1198_v3 = vmul.f32 1.442695, %v1870_v2 }
 0x917   :  { %v1181_v4 = vpop.xlane.xlu0 %1180 }
 0x918   :  { %v1873_v5 = vsub.f32 %v1158_v52, %v1181_v4  ;;  %1695 = vpow2.f32 %v1198_v3 }
 0x91a   :  { %v1204_v6 = vmul.f32 1.442695, %v1873_v5 }
 0x91b   :  { %v1183_v7 = vpop.xlane.xlu1 %1182  ;;  %v1185_v8 = vpop.xlane.xlu0 %1184 }
 0x91c   :  { %1697 = vpow2.f32 %v1204_v6  ;;  %v1876_v9 = vsub.f32 %v1161_v12, %v1183_v7  ;;  %v1878_v10 = vsub.f32 %v1166_v54, %v1185_v8 }
 0x91e   :  { %v1206_v11 = vmul.f32 1.442695, %v1876_v9  ;;  %v1208_v13 = vmul.f32 1.442695, %v1878_v10 }
 0x91f   :  { %v1690_v14 = vpop.eup %1689  ;;  %v1187_v15 = vpop.xlane.xlu1 %1186 }
 0x920   :  { %1699 = vpow2.f32 %v1206_v11  ;;  %v1882_v16 = vsub.f32 %v1169_v55, %v1187_v15  ;;  %1216 = vadd.xlane.f32.xlu0 %v1690_v14 }
 0x921   :  { %1701 = vpow2.f32 %v1208_v13  ;;  %v1692_v17 = vpop.eup %1691 }
 0x922   :  { %v1210_v18 = vmul.f32 1.442695, %v1882_v16 }
 0x923   :  { %v1694_v19 = vpop.eup %1693 }
 0x924   :  { %1703 = vpow2.f32 %v1210_v18  ;;  %1218 = vadd.xlane.f32.xlu1 %v1694_v19  ;;  %1212 = vadd.xlane.f32.xlu0 %v1692_v17 }
 0x925   :  { %v1696_v20 = vpop.eup %1695 }
 0x928   :  { %1214 = vadd.xlane.f32.xlu1 %v1696_v20 }
 0x929   :  { %v1698_v21 = vpop.eup %1697 }
 0x92a   :  { %1220 = vadd.xlane.f32.xlu0 %v1698_v21 }
 0x92d   :  { %v1700_v22 = vpop.eup %1699 }
 0x92e   :  { %v1702_v23 = vpop.eup %1701  ;;  %1222 = vadd.xlane.f32.xlu1 %v1700_v22 }
 0x92f   :  { %1224 = vadd.xlane.f32.xlu0 %v1702_v23 }
 0x931   :  { %v1704_v24 = vpop.eup %1703 }
 0x932   :  { %1226 = vadd.xlane.f32.xlu1 %v1704_v24 }
 0x9a9   :  { %v1217_v25 = vpop.xlane.xlu0 %1216 }
 0x9aa   :  { %1705 = vlog2.f32 %v1217_v25 }
 0x9ad   :  { %v1219_v28 = vpop.xlane.xlu1 %1218  ;;  %v1213_v29 = vpop.xlane.xlu0 %1212 }
 0x9ae   :  { %1707 = vlog2.f32 %v1219_v28 }
 0x9af   :  { %1709 = vlog2.f32 %v1213_v29 }
 0x9b1   :  { %v1215_v31 = vpop.xlane.xlu1 %1214 }
 0x9b2   :  { %1711 = vlog2.f32 %v1215_v31 }
 0x9b3   :  { %v1221_v32 = vpop.xlane.xlu0 %1220 }
 0x9b4   :  { %1713 = vlog2.f32 %v1221_v32 }
 0x9b7   :  { %v1706_v33 = vpop.eup %1705  ;;  %v1223_v34 = vpop.xlane.xlu1 %1222 }
 0x9b8   :  { %v1233_v35 = vmul.f32 0.6931472, %v1706_v33  ;;  %1715 = vlog2.f32 %v1223_v34  ;;  %v1225_v36 = vpop.xlane.xlu0 %1224 }
 0x9b9   :  { %1717 = vlog2.f32 %v1225_v36 }
 0x9ba   :  { %v1246_v37 = vsub.f32 %v1861_v57, %v1233_v35 }
 0x9bb   :  { %v1708_v38 = vpop.eup %1707  ;;  %v1227_v39 = vpop.xlane.xlu1 %1226 }
 0x9bc   :  { %v1710_v40 = vpop.eup %1709  ;;  %1254 = vst [vmem:[%s1921_s4 + $0x10] sm:$0xff] %v1246_v37  ;;  %v1235_v41 = vmul.f32 0.6931472, %v1708_v38  ;;  %1719 = vlog2.f32 %v1227_v39 }
 0x9bd   :  { %v1229_v42 = vmul.f32 0.6931472, %v1710_v40 }
 0x9be   :  { %v1247_v43 = vsub.f32 %v1867_v63, %v1235_v41 }
 0x9bf   :  { %v1712_v44 = vpop.eup %1711  ;;  %v1244_v45 = vsub.f32 %v1864_v60, %v1229_v42 }
 0x9c0   :  { %1255 = vst [vmem:[%s1921_s4 + $0x18] sm:$0xff] %v1247_v43  ;;  %v1231_v46 = vmul.f32 0.6931472, %v1712_v44 }
 0x9c1   :  { %v1714_v47 = vpop.eup %1713  ;;  %1252 = vst [vmem:[%s1921_s4] sm:$0xff] %v1244_v45 }
 0x9c2   :  { %v1245_v48 = vsub.f32 %v1870_v2, %v1231_v46  ;;  %v1237_v49 = vmul.f32 0.6931472, %v1714_v47 }
 0x9c4   :  { %1253 = vst [vmem:[%s1921_s4 + $0x8] sm:$0xff] %v1245_v48  ;;  %v1248_v50 = vsub.f32 %v1873_v5, %v1237_v49 }
 0x9c5   :  { %v1716_v26 = vpop.eup %1715 }
 0x9c6   :  { %v1718_v51 = vpop.eup %1717  ;;  %1256 = vst [vmem:[%s1921_s4 + $0x20] sm:$0xff] %v1248_v50  ;;  %v1239_v27 = vmul.f32 0.6931472, %v1716_v26 }
 0x9c7   :  { %v1241_v52 = vmul.f32 0.6931472, %v1718_v51 }
 0x9c8   :  { %v1249_v30 = vsub.f32 %v1876_v9, %v1239_v27 }
 0x9c9   :  { %v1720_v53 = vpop.eup %1719  ;;  %v1250_v54 = vsub.f32 %v1878_v10, %v1241_v52 }
 0x9ca   :  { %1257 = vst [vmem:[%s1921_s4 + $0x28] sm:$0xff] %v1249_v30  ;;  %v1243_v12 = vmul.f32 0.6931472, %v1720_v53 }
 0x9cb   :  { %1258 = vst [vmem:[%s1921_s4 + $0x30] sm:$0xff] %v1250_v54 }
 0x9cc   :  { %v1251_v55 = vsub.f32 %v1882_v16, %v1243_v12 }
 0x9ce   :  { %1259 = vst [vmem:[%s1921_s4 + $0x38] sm:$0xff] %v1251_v55 }
 0x9cf   :  { %1264 = vsyncpa [#allocation3], 1 }

</bundles_post_ra>
